<compile_context>
chip_gen: v7x
topology: tpu7x:2x2x1
jax: 0.10.0
libtpu: 0.0.40
codegen_flags: <defaults>
</compile_context>

<pallas_src>
import jax
import jax.numpy as jnp
from jax.experimental import pallas as pl
from jax.experimental.pallas import tpu as pltpu


def _shortcut_kernel(x_ref, w_ref, b_ref, o_ref):
    # x_ref: (1, Cin,  tp)   spatially-flattened input slab for one sample
    # w_ref: (Cout, Cin)     conv1x1 weight with BN scale pre-folded
    # b_ref: (Cout, 1)       folded BN shift (f32)
    # o_ref: (1, Cout, tp)
    x = x_ref[0]                                                   # (Cin, tp)
    y = jnp.dot(w_ref[...], x, preferred_element_type=jnp.float32)  # (Cout, tp)
    y = y + b_ref[...]                                             # f32 affine
    o_ref[0] = jnp.maximum(y, 0.0).astype(o_ref.dtype)


def _choose_spatial_tile(p, cin, cout, itemsize, budget_bytes=24 * 1024 * 1024):
    """Largest lane tile (multiple of 128, or the full spatial extent) whose
    double-buffered input+output blocks fit the VMEM budget."""
    per_col = 2 * itemsize * (cin + cout)             # x + out, double-buffered
    fixed = 2 * itemsize * cin * cout + 2 * 4 * cout  # weight + shift buffers
    avail = max(budget_bytes - fixed, 128 * per_col)
    max_tp = max(128, (avail // per_col) // 128 * 128)
    return p if p <= max_tp else int(max_tp)


def _conv_bn_relu_pallas(x_ncp, w_scaled, shift, out_dtype):
    n, cin, p = x_ncp.shape
    cout = w_scaled.shape[0]
    itemsize = jnp.dtype(x_ncp.dtype).itemsize

    tp = _choose_spatial_tile(p, cin, cout, itemsize)
    # Keep >= 2 grid steps when possible so v7x's two TensorCores both run.
    if n * pl.cdiv(p, tp) < 2 and p >= 256:
        tp = max(128, (p // 2) // 128 * 128)
    grid = (n, pl.cdiv(p, tp))

    return pl.pallas_call(
        _shortcut_kernel,
        out_shape=jax.ShapeDtypeStruct((n, cout, p), out_dtype),
        grid_spec=pltpu.PrefetchScalarGridSpec(
            num_scalar_prefetch=0,
            grid=grid,
            in_specs=[
                pl.BlockSpec((1, cin, tp), lambda i, j: (i, 0, j)),
                pl.BlockSpec((cout, cin), lambda i, j: (0, 0)),
                pl.BlockSpec((cout, 1), lambda i, j: (0, 0)),
            ],
            out_specs=pl.BlockSpec((1, cout, tp), lambda i, j: (i, 0, j)),
        ),
        compiler_params=pltpu.CompilerParams(
            dimension_semantics=("parallel", "parallel"),
            vmem_limit_bytes=48 * 1024 * 1024,
        ),
    )(x_ncp, w_scaled, shift)


class ShortcutParams:
    """Deterministically initialized parameters mirroring nn.Conv2d + nn.BatchNorm2d."""

    def __init__(self, in_ch: int, out_ch: int, stride: int, key):
        self.in_ch = in_ch
        self.out_ch = out_ch
        self.stride = stride
        self.use_identity = (in_ch == out_ch) and (stride == 1)
        if not self.use_identity:
            kw, kg, kb, km, kv = jax.random.split(key, 5)
            # Conv2d(in_ch, out_ch, kernel_size=1, bias=False): weight (out_ch, in_ch).
            bound = 1.0 / jnp.sqrt(in_ch)
            self.conv_w = jax.random.uniform(
                kw, (out_ch, in_ch), jnp.float32, -bound, bound
            )
            # BatchNorm2d(out_ch) inference-mode params.
            self.bn_gamma = jax.random.uniform(kg, (out_ch,), jnp.float32, 0.5, 1.5)
            self.bn_beta = jax.random.uniform(kb, (out_ch,), jnp.float32, -0.5, 0.5)
            self.bn_mean = jax.random.uniform(km, (out_ch,), jnp.float32, -0.1, 0.1)
            self.bn_var = jax.random.uniform(kv, (out_ch,), jnp.float32, 0.5, 1.5)
            self.bn_eps = 1e-5


def shortcut_forward(params: ShortcutParams, x_nchw: jnp.ndarray) -> jnp.ndarray:
    """x_nchw: (N, Cin, H, W) -> (N, Cout, Ho, Wo), NCHW (PyTorch convention)."""
    if params.use_identity:
        return x_nchw

    n, cin, h, w = x_nchw.shape
    s = params.stride

    # 1x1 conv with stride s == channel matmul on the spatially subsampled input.
    x_str = x_nchw[:, :, ::s, ::s] if s > 1 else x_nchw        # (N, Cin, Ho, Wo)
    ho, wo = x_str.shape[2], x_str.shape[3]
    x_ncp = x_str.reshape(n, cin, ho * wo)                     # contiguous, free

    # Fold BN (inference) into the weight + a per-channel shift.
    scale = params.bn_gamma / jnp.sqrt(params.bn_var + params.bn_eps)
    shift = (params.bn_beta - params.bn_mean * scale).astype(jnp.float32)[:, None]
    w_scaled = (params.conv_w * scale[:, None]).astype(x_nchw.dtype)   # (Cout, Cin)

    # Note: for tiny tensors a plain XLA path would avoid kernel-launch
    # overhead; we always dispatch the Pallas kernel here so it is exercised.
    y_ncp = _conv_bn_relu_pallas(x_ncp, w_scaled, shift, x_nchw.dtype)
    return y_ncp.reshape(n, params.out_ch, ho, wo)


if __name__ == "__main__":
    key = jax.random.PRNGKey(0)
    k_param, k_x = jax.random.split(key)

    # Non-identity shortcut: in_ch=4 -> out_ch=8, stride=2.
    in_ch, out_ch, stride = 4, 8, 2
    params = ShortcutParams(in_ch, out_ch, stride, k_param)

    x = jax.random.normal(k_x, (2, in_ch, 16, 16), dtype=jnp.float32)  # NCHW

    y = shortcut_forward(params, x)
    jax.block_until_ready(y)
    assert y.shape == (2, out_ch, 8, 8), y.shape

    # Reference check in plain JAX (same folded-BN inference semantics).
    x_sub = jnp.transpose(x, (0, 2, 3, 1))[:, ::stride, ::stride, :]
    ref = jnp.einsum("nhwc,oc->nhwo", x_sub, params.conv_w)
    scale = params.bn_gamma / jnp.sqrt(params.bn_var + params.bn_eps)
    shift = params.bn_beta - params.bn_mean * scale
    ref = jnp.maximum(ref * scale + shift, 0.0)
    ref = jnp.transpose(ref, (0, 3, 1, 2))
    assert jnp.allclose(y, ref, atol=1e-5, rtol=1e-5)

    # Identity path sanity check.
    params_id = ShortcutParams(4, 4, 1, k_param)
    y_id = shortcut_forward(params_id, x)
    jax.block_until_ready(y_id)
    assert jnp.array_equal(y_id, x)

    print("KERNEL_OK")
</pallas_src>

<mosaic_0001>
module attributes {stable_mosaic.version = 11 : i64} {
  func.func @_shortcut_kernel(%arg0: i32, %arg1: i32, %arg2: memref<1x4x64xf32, #tpu.memory_space<vmem>>, %arg3: memref<8x4xf32, #tpu.memory_space<vmem>>, %arg4: memref<8x1xf32, #tpu.memory_space<vmem>>, %arg5: memref<1x8x64xf32, #tpu.memory_space<vmem>>) attributes {dimension_semantics = [#tpu.dimension_semantics<parallel>, #tpu.dimension_semantics<parallel>], iteration_bounds = array<i64: 2, 1>, scalar_prefetch = 0 : i64, scratch_operands = 0 : i64, tpu.core_type = #tpu.core_type<tc>, window_params = [{transform_indices = @transform_0, window_bounds = array<i64: 1, 4, 64>}, {pipeline_mode = #tpu.pipeline_mode<synchronous>, transform_indices = @transform_1, window_bounds = array<i64: 8, 4>}, {pipeline_mode = #tpu.pipeline_mode<synchronous>, transform_indices = @transform_2, window_bounds = array<i64: 8, 1>}, {transform_indices = @transform_3, window_bounds = array<i64: 1, 8, 64>}]} {
    %c0 = arith.constant 0 : index
    %c0_0 = arith.constant 0 : index
    %c0_1 = arith.constant 0 : index
    %0 = vector.load %arg2[%c0, %c0_0, %c0_1] : memref<1x4x64xf32, #tpu.memory_space<vmem>>, vector<1x4x64xf32>
    %1 = vector.shape_cast %0 : vector<1x4x64xf32> to vector<4x64xf32>
    %c0_2 = arith.constant 0 : index
    %c0_3 = arith.constant 0 : index
    %2 = vector.load %arg3[%c0_2, %c0_3] : memref<8x4xf32, #tpu.memory_space<vmem>>, vector<8x4xf32>
    %cst = arith.constant dense<0.000000e+00> : vector<8x64xf32>
    %3 = tpu.matmul %2, %1, %cst {dimension_numbers = #tpu.dot_dimension_numbers<[1], [0], [0], [1], [0, 0, 1, 1], [], []>} : vector<8x4xf32>, vector<4x64xf32>, vector<8x64xf32> -> vector<8x64xf32>
    %c0_4 = arith.constant 0 : index
    %c0_5 = arith.constant 0 : index
    %4 = vector.load %arg4[%c0_4, %c0_5] : memref<8x1xf32, #tpu.memory_space<vmem>>, vector<8x1xf32>
    %5 = vector.broadcast %4 : vector<8x1xf32> to vector<8x64xf32>
    %6 = arith.addf %3, %5 : vector<8x64xf32>
    %cst_6 = arith.constant 0.000000e+00 : f32
    %7 = vector.broadcast %cst_6 : f32 to vector<8x64xf32>
    %8 = arith.maximumf %6, %7 : vector<8x64xf32>
    %c0_7 = arith.constant 0 : index
    %c0_8 = arith.constant 0 : index
    %c0_9 = arith.constant 0 : index
    %9 = vector.load %arg5[%c0_7, %c0_8, %c0_9] : memref<1x8x64xf32, #tpu.memory_space<vmem>>, vector<1x8x64xf32>
    %10 = vector.shape_cast %9 : vector<1x8x64xf32> to vector<8x64xf32>
    %11 = vector.shape_cast %8 : vector<8x64xf32> to vector<1x8x64xf32>
    tpu.vector_store %arg5[%c0_7, %c0_8, %c0_9], %11 {strides = array<i32>} : memref<1x8x64xf32, #tpu.memory_space<vmem>>, vector<1x8x64xf32>,
    return
  }
  func.func @transform_0(%arg0: i32, %arg1: i32) -> (i32, i32, i32) {
    %c0_i32 = arith.constant 0 : i32
    %c0_i32_0 = arith.constant 0 : i32
    return %arg0, %c0_i32, %arg1 : i32, i32, i32
  }
  func.func @transform_1(%arg0: i32, %arg1: i32) -> (i32, i32) {
    %c0_i32 = arith.constant 0 : i32
    %c0_i32_0 = arith.constant 0 : i32
    %c0_i32_1 = arith.constant 0 : i32
    return %c0_i32, %c0_i32_0 : i32, i32
  }
  func.func @transform_2(%arg0: i32, %arg1: i32) -> (i32, i32) {
    %c0_i32 = arith.constant 0 : i32
    %c0_i32_0 = arith.constant 0 : i32
    %c0_i32_1 = arith.constant 0 : i32
    return %c0_i32, %c0_i32_0 : i32, i32
  }
  func.func @transform_3(%arg0: i32, %arg1: i32) -> (i32, i32, i32) {
    %c0_i32 = arith.constant 0 : i32
    %c0_i32_0 = arith.constant 0 : i32
    return %arg0, %c0_i32, %arg1 : i32, i32, i32
  }
}

</mosaic_0001>

<bundles_post_ra>
// kernel: tpu_custom_call.1
= control target key start
LH: loop header
LB: loop body
LE: loop exit
PB: predicated region body
PF: predicated region fallthrough
CT: control target
= control target key end

     0   :  { %8 = vsyncpa [#allocation3], 0  ;;  %s667_s0 = inlined_call_operand.vmem [shape: f32[2,4,64], index: 0, kind: input, shape index: {}]   ;;  %s668_s1 = inlined_call_operand.vmem [shape: f32[8,4], index: 1, kind: input, shape index: {}]   ;;  %s669_s2 = inlined_call_operand.vmem [shape: f32[8,1], index: 2, kind: input, shape index: {}]   ;;  %s670_s3 = inlined_call_operand.hbm [shape: f32[2,8,64], index: 3, kind: output, shape index: {}]  }
   0x1   :  { %10 = vsyncpa [#allocation3 + $0x1], 0  ;;  %s549_s12 = smov 0   ;;  %s551_s13 = smov 0  }
   0x2   :  { %s553_s14 = smov 0   ;;  %s555_s15 = smov 0  }
   0x3   :  { %s557_s16 = smov 0   ;;  %s559_s17 = smov 0  }
   0x4 LB: > { %s366_s18 = sadd.s32 4294967295, %s523_s17   ;;  %s367_s19 = sadd.s32 4294967294, %s523_s17   ;;  %s523_s17 = sphi %s559_s17, %s16_s17   ;;  %s519_s16 = sphi %s557_s16, %s677_s16   ;;  %s515_s15 = sphi %s555_s15, %s676_s15   ;;  %s511_s14 = sphi %s553_s14, %s675_s14   ;;  %s507_s13 = sphi %s551_s13, %s674_s13   ;;  %s503_s12 = sphi %s549_s12, %s673_s12  }
   0x5   : > { %s28_s20 = sadd.s32 1, %s519_s16  ;;  %s107_s21 = sadd.s32 1, %s511_s14 }
   0x6   : > { %p30_p0 = scmp.ge.s32.totalorder %s28_s20, 2  ;;  %p117_p1 = scmp.ne.s32.totalorder %s511_s14, %s507_s13 }
   0x7   : > { %p118_p2 = scmp.eq.s32.totalorder %s366_s18, 1  ;;  %p123_p3 = scmp.ne.s32.totalorder %s507_s13, %s503_s12 }
   0x8   : > { %s679_s20 = smov (%p30_p0, %s28_s20), 0  ;;  %p124_p5 = scmp.eq.s32.totalorder %s367_s19, 1 }
   0x9   : > { %p589_p4 = por %p118_p2, %p117_p1  ;;  %s102_s23 = ssub.s32 %s519_s16, %s679_s20 }
   0xa   : > { %p370_p6 = scmp.ge.s32.totalorder %s523_s17, 1  ;;  %p105_p7 = scmp.eq.s32.totalorder %s102_s23, 0 }
   0xb   : > { %p596_p8 = por %p124_p5, %p123_p3  ;;  %p158_p9 = scmp.lt.s32.totalorder %s523_s17, 3 }
   0xc   : > { %s602_s25 = scalar_select %p105_p7, %s511_s14, %s107_s21  }
   0xd   : > { %p159_p10 = pnand %p370_p6, %p158_p9 }
   0xe   : > { %p184_p11 = scmp.lt.s32.totalorder (!%p159_p10), %s515_s15, 1  ;;  %v525_v0 = vmov (!%p159_p10), 0.0   ;;  %vm526_vm0 = vmmov (!%p159_p10), 0   ;;  %v193_v1 = vld [vmem:[%s669_s2] sm:$0xff] (!%p159_p10)  ;;  %v527_v2 = vmov (!%p159_p10), 0   ;;  %vm203_vm1 = vcmask (!%p159_p10), 1043456  }
   0xf   : > { %162 = sbr.rel (%p159_p10) target bundleno = 258 (0x102), region = 32  ;;  %381 = vmatprep.subr.mxu0 (!%p159_p10), %v525_v0  ;;  %383 = vmatprep.mubr.msk.f32.mxu0 (!%p159_p10), %vm526_vm0, %v525_v0  ;;  %v192_v3 = vld [vmem:[%s668_s1] sm:$0xff] (!%p159_p10)  ;;  %vm199_vm2 = vcmask (!%p159_p10), 31744   ;;  %s181_s8 = sand.u32 (!%p159_p10), 1, %s507_s13   ;;  %vm278_vm3 = vcmask (!%p159_p10), 523264  }
  0x10   : > { %444 = vset.pattern.permute.xlu0 (!%p159_p10), %v527_v2  ;;  %s371_s9 = sshll.u32 (!%p159_p10), %s181_s8, 3  ;;  %s376_s10 = sshll.u32 (!%p159_p10), %s515_s15, 7 }
  0x11   : > { %196 = vperm.xlu0 (!%p159_p10), %444, %v193_v1   ;;  %s183_s11 = scalar_lea.vmem (!%p159_p10), [#allocation2], %s371_s9  ;;  %s620_s23 = scalar_lea.hbm (!%p159_p10), %s670_s3, %s376_s10 }
  0x12   : > { %s295_s18 = sshll.u32 (!%p159_p10), %s183_s11, 4  ;;  %s281_s26 = scalar_lea.sflag (!%p159_p10), [#allocation3], %s181_s8  ;;  %s622_s18 = int_to_ptr.vmem [resolvable:$true] %s295_s18 }
  0x13   : > { %s445_s27 = scalar_lea.vmem (!%p159_p10), %s622_s18, 128 }
  0x14   : > { %p446_p12 = scmp.ne.s32.totalorder (!%p159_p10), %s622_s18, %s445_s27 }
  0x16   : > { %s185_s28 = scalar_select %p184_p11, %s515_s15, 1 }
  0x17   : > { %p447_p13 = pnand %p446_p12, %p589_p4  ;;  %s528_s15 = smov [#allocation2]  }
  0x18   : > { %s372_s29 = sshll.u32 %s185_s28, 2  ;;  %s449_s28 = sshll.u32 %s528_s15, 4  ;;  %s450_s28 = int_to_ptr.vmem [resolvable:$false] %s449_s28 }
  0x19   : > { %s190_s5 = scalar_lea.vmem %s667_s0, %s372_s29  ;;  %p448_p0 = pneg %p447_p13 }
  0x1a   : > { %v191_v4 = vld [vmem:[%s190_s5] sm:$0xf]  ;;  %s451_s29 = scalar_lea.vmem %s450_s28, 256  ;;  %p452_p1 = scmp.lt.s32.totalorder %s622_s18, %s450_s28 }
  0x1b   : > { %382 = vmatpush3.msk.msra.mxu0 %vm203_vm1, %v191_v4  ;;  %p453_p2 = scmp.lt.s32.totalorder %s451_s29, %s445_s27 }
  0x1c   : > { %384 = vmatmul.mubr.msk.f32.vlgmr.msra.gmra.mrb[0].mxu0 %vm199_vm2, %v192_v3 }
  0x1d   : > { %p454_p3 = por %p453_p2, %p452_p1 }
  0x1f   : > { %p455_p5 = pnand %p454_p3, %p448_p0 }
  0x90   : > { %v197_v5 = vpop.permute.xlu0 %196 }
  0xef   : > { %v273_v6 = vpop.f32.mrb[0].mxu0 }
  0xf0   : > { %v274_v7 = vadd.f32 %v273_v6, %v197_v5  ;;  %v385_v8 = vpop.f32.mrb[1].mxu0 }
  0xf2   : > { %v277_v9 = vmax.f32 %v274_v7, 0.0 }
  0xf4   : > { %279 = vst.msk [vmem:[%s183_s11] sm:$0xff] %vm278_vm3, %v277_v9 }
  0xf5   : > { %458 = shalt.err (!%p455_p5)
}
  0xf6   : > { %s459_s30 = scalar_lea.hbm %s620_s23, 128  ;;  %s463_s6 = scalar_lea.hbm %s670_s3, 256 }
  0xf7   : > { %p460_p6 = scmp.ne.s32.totalorder %s620_s23, %s459_s30  ;;  %p464_p10 = scmp.lt.u32.totalorder %s620_s23, %s670_s3 }
  0xf8   : > { %p465_p11 = scmp.lt.u32.totalorder %s463_s6, %s459_s30  ;;  %p467_p13 = scmp.lt.u32.totalorder %s459_s30, %s620_s23 }
  0xf9   : > { %p461_p7 = pnand %p460_p6, %p589_p4 }
  0xfa   : > { %p466_p12 = por %p465_p11, %p464_p10 }
  0xfb   : > { %p462_p9 = pneg %p461_p7 }
  0xfc   : > { %p468_p0 = por %p467_p13, %p466_p12 }
  0xfe   : > { %p469_p1 = pnand %p468_p0, %p462_p9 }
 0x100   : > { %472 = shalt.err (!%p469_p1)
}
 0x101   : > { %386 = dma.vmem_to_hbm [thread:$0]  (%p589_p4), %s622_s18, 128, %s620_s23, %s281_s26  }
 0x102 PF: > { %p392_p2 = scmp.ge.s32.totalorder %s523_s17, 2  ;;  %s307_s9 = sand.u32 1, %s503_s12  }
 0x103   : > { %s308_s10 = scalar_lea.sflag [#allocation3], %s307_s9 }
 0x104   : > { %p389_p3 = pnand %p392_p2, %p596_p8 }
 0x106   : > { %498 = dma.done.wait (!%p389_p3), %s308_s10, 128  }
 0x107   : > { %500 = vsyncadd (!%p389_p3), %s308_s10, 4294967168  ;;  %s16_s17 = sadd.s32 1, %s523_s17   ;;  %s673_s12 = smov %s507_s13 }
 0x108   : > { %p13_p5 = scmp.ge.s32.totalorder %s16_s17, 4   ;;  %s674_s13 = smov %s511_s14 }
 0x109   : > { %s675_s14 = smov %s602_s25  ;;  %s676_s15 = smov %s519_s16 }
 0x10a   : > { %s677_s16 = smov %s679_s20  ;;  %15 = sbr.rel (!%p13_p5) target bundleno = 4 (0x4), region = 67 }
 0x111   :  { %313 = vsyncpa [#allocation3], 1 }
 0x112   :  { %315 = vsyncpa [#allocation3 + $0x1], 1 }

</bundles_post_ra>
